<compile_context>
chip_gen: v7x
topology: tpu7x:2x2x1
jax: 0.10.0
libtpu: 0.0.40
codegen_flags: <defaults>
</compile_context>

<pallas_src>
import functools
import math

import jax
import jax.numpy as jnp
from jax.experimental import pallas as pl
from jax.experimental.pallas import tpu as pltpu


def _swp_kernel(x_ref, w_ref, o_ref, acc_ref, l_ref, *, seq_len, ragged_t):
    # x_ref: (bt, tc, D) input tile; w_ref: (1, D) shared weights (DMA'd once)
    # o_ref: (bt, D) pooled output (resident across the T grid axis)
    # acc_ref: (bt, D) f32 weighted-sum accumulator; l_ref: (bt, 1) f32 softmax normalizer
    t = pl.program_id(1)

    @pl.when(t == 0)
    def _init():
        acc_ref[...] = jnp.zeros_like(acc_ref)
        l_ref[...] = jnp.zeros_like(l_ref)

    x = x_ref[...]                                        # (bt, tc, D), native dtype
    bt, tc, d = x.shape
    w = w_ref[...].astype(jnp.float32).reshape(1, 1, d)   # (1, 1, D)

    # Scores as a packed (bt, tc) f32 array: VPU multiply + lane reduction over D.
    s = jnp.sum(x.astype(jnp.float32) * w, axis=-1)       # (bt, tc)
    # tanh bounds scores to [-1, 1] -> exp in [1/e, e]; softmax is shift-invariant,
    # so no max-subtraction / online-max is needed (valid only because tanh=True).
    e = jnp.exp(jnp.tanh(s))                              # (bt, tc) f32

    if ragged_t:
        # Mask garbage positions of the final (partial) T block so they cannot
        # pollute the normalizer or the weighted sum of valid rows.
        pos = t * tc + jax.lax.broadcasted_iota(jnp.int32, (bt, tc), 1)
        valid = pos < seq_len
        e = jnp.where(valid, e, 0.0)
        x = jnp.where(valid[:, :, None], x, jnp.zeros_like(x))

    l_ref[...] += jnp.sum(e, axis=-1, keepdims=True)      # (bt, 1)

    # Weighted partial sum over this T tile on the MXU: (bt,1,tc) @ (bt,tc,D) -> (bt,1,D).
    part = jnp.einsum("bqk,bkd->bqd", e[:, None, :].astype(x.dtype), x,
                      preferred_element_type=jnp.float32)
    acc_ref[...] += part[:, 0, :]

    @pl.when(t == pl.num_programs(1) - 1)
    def _finalize():
        o_ref[...] = (acc_ref[...] / l_ref[...]).astype(o_ref.dtype)


def _vmem_budget_bytes():
    try:
        cap = pltpu.get_tpu_info().vmem_capacity_bytes
    except Exception:
        cap = 64 * 1024 * 1024
    # ~3/4 of physical VMEM: ~48 MiB on v7x (64 MiB/TC), ~96 MiB on v5e/v6e (128 MiB).
    return int(max(min((cap * 3) // 4, 100 * 1024 * 1024), 32 * 1024 * 1024))


def _choose_tiles(B, T, D, in_itemsize, budget):
    """Pick (bt, tc). bt is a multiple of 8 or equals B; tc is a multiple of 8 or equals T."""
    def footprint(bt, tc):
        inp = 2 * bt * tc * D * in_itemsize      # double-buffered input block
        tmp = 2 * bt * tc * D * 4                # f32 elementwise temporaries (conservative)
        out = 2 * bt * D * in_itemsize           # double-buffered output block
        scr = bt * D * 4 + bt * 512              # acc + l scratch
        return inp + tmp + out + scr + 2 * D * 4 + (2 << 20)

    # Preferred: full-T blocks with as many batch rows as fit the budget.
    bt = min(B, 512)
    while bt > 8 and footprint(bt, T) > budget:
        bt //= 2
    if bt > 8:
        bt = (bt // 8) * 8
    if footprint(bt, T) <= budget and (bt >= 8 or bt == B):
        if bt >= B and B > 8:
            # Whole batch fit in one step: split into >=2 steps so v7x's two
            # TensorCores both get work (negligible cost on single-TC v5e/v6e).
            bt = ((B + 1) // 2 + 7) // 8 * 8
        return bt, T

    # Long-sequence fallback: keep >=8 batch rows (dense output tiles), tile T instead.
    bt = min(B, 8)
    tc = T
    while tc > 8 and footprint(bt, tc) > budget:
        tc = -(-tc // 2)
    if T >= 8:
        tc = min(max(8, (tc // 8) * 8), T)
    return bt, tc


def self_weighted_pooling(inputs, mm_weights):
    """inputs: (B, T, D), mm_weights: (1, D) -> (B, D). num_head=1, asp=False, tanh=True."""
    B, T, D = inputs.shape
    assert mm_weights.shape == (1, D), "only num_head=1 is supported"

    itemsize = jnp.dtype(inputs.dtype).itemsize
    budget = _vmem_budget_bytes()
    bt, tc = _choose_tiles(B, T, D, itemsize, budget)

    grid = (pl.cdiv(B, bt), pl.cdiv(T, tc))
    kernel = functools.partial(_swp_kernel, seq_len=T, ragged_t=(T % tc != 0))

    return pl.pallas_call(
        kernel,
        out_shape=jax.ShapeDtypeStruct((B, D), inputs.dtype),
        grid_spec=pltpu.PrefetchScalarGridSpec(
            num_scalar_prefetch=0,
            grid=grid,
            in_specs=[
                pl.BlockSpec((bt, tc, D), lambda b, t: (b, t, 0)),   # input tile
                pl.BlockSpec((1, D), lambda b, t: (0, 0)),           # shared weights
            ],
            out_specs=pl.BlockSpec((bt, D), lambda b, t: (b, 0)),    # resident over T axis
            scratch_shapes=[
                pltpu.VMEM((bt, D), jnp.float32),   # weighted-sum accumulator
                pltpu.VMEM((bt, 1), jnp.float32),   # softmax normalizer (sum of exp)
            ],
        ),
        compiler_params=pltpu.CompilerParams(
            dimension_semantics=("parallel", "arbitrary"),
            vmem_limit_bytes=budget,
        ),
    )(inputs, mm_weights)


def _reference(inputs, mm_weights):
    # Pure-JAX reference mirroring the PyTorch forward (num_head=1, asp=False, tanh=True).
    scores = jnp.einsum("btd,hd->bth", inputs, mm_weights)        # (B, T, 1)
    attn = jax.nn.softmax(jnp.tanh(scores), axis=1)               # softmax over T
    weighted = inputs * attn                                      # broadcast over D
    return weighted.sum(axis=1)                                   # (B, D)


if __name__ == "__main__":
    key = jax.random.PRNGKey(0)
    k_x, k_w = jax.random.split(key)

    batch, seq, feature_dim = 2, 8, 32
    num_head = 1

    x = jax.random.normal(k_x, (batch, seq, feature_dim), dtype=jnp.float32)

    # kaiming_uniform_ on a (num_head, feature_dim) tensor: fan_in = feature_dim,
    # bound = sqrt(6 / fan_in)
    bound = math.sqrt(6.0 / feature_dim)
    mm_weights = jax.random.uniform(
        k_w, (num_head, feature_dim), dtype=jnp.float32, minval=-bound, maxval=bound
    )

    out = jax.block_until_ready(self_weighted_pooling(x, mm_weights))

    ref = _reference(x, mm_weights)
    assert out.shape == (batch, feature_dim)
    assert jnp.allclose(out, ref, atol=1e-4, rtol=1e-4), float(jnp.max(jnp.abs(out - ref)))

    print("KERNEL_OK")
</pallas_src>

<mosaic_0001>
module attributes {stable_mosaic.version = 11 : i64} {
  func.func @_swp_kernel(%arg0: i32, %arg1: i32, %arg2: memref<2x8x32xf32, #tpu.memory_space<vmem>>, %arg3: memref<1x32xf32, #tpu.memory_space<vmem>>, %arg4: memref<2x32xf32, #tpu.memory_space<vmem>>, %arg5: memref<2x32xf32, #tpu.memory_space<vmem>>, %arg6: memref<2x1xf32, #tpu.memory_space<vmem>>) attributes {dimension_semantics = [#tpu.dimension_semantics<parallel>, #tpu.dimension_semantics<arbitrary>], iteration_bounds = array<i64: 1, 1>, scalar_prefetch = 0 : i64, scratch_operands = 2 : i64, tpu.core_type = #tpu.core_type<tc>, window_params = [{transform_indices = @transform_0, window_bounds = array<i64: 2, 8, 32>}, {pipeline_mode = #tpu.pipeline_mode<synchronous>, transform_indices = @transform_1, window_bounds = array<i64: 1, 32>}, {transform_indices = @transform_2, window_bounds = array<i64: 2, 32>}]} {
    %c0_i32 = arith.constant 0 : i32
    %0 = arith.cmpi eq, %arg1, %c0_i32 : i32
    %1 = arith.extui %0 : i1 to i32
    %c0_i32_0 = arith.constant 0 : i32
    %2 = arith.cmpi ne, %1, %c0_i32_0 : i32
    scf.if %2 {
      %cst_17 = arith.constant 0.000000e+00 : f32
      %25 = vector.broadcast %cst_17 : f32 to vector<2x32xf32>
      %c0_18 = arith.constant 0 : index
      %c0_19 = arith.constant 0 : index
      %26 = vector.load %arg5[%c0_18, %c0_19] : memref<2x32xf32, #tpu.memory_space<vmem>>, vector<2x32xf32>
      tpu.vector_store %arg5[%c0_18, %c0_19], %25 {strides = array<i32>} : memref<2x32xf32, #tpu.memory_space<vmem>>, vector<2x32xf32>,
      %cst_20 = arith.constant 0.000000e+00 : f32
      %27 = vector.broadcast %cst_20 : f32 to vector<2x1xf32>
      %c0_21 = arith.constant 0 : index
      %c0_22 = arith.constant 0 : index
      %28 = vector.load %arg6[%c0_21, %c0_22] : memref<2x1xf32, #tpu.memory_space<vmem>>, vector<2x1xf32>
      tpu.vector_store %arg6[%c0_21, %c0_22], %27 {strides = array<i32>} : memref<2x1xf32, #tpu.memory_space<vmem>>, vector<2x1xf32>,
    } else {
    }
    %c0 = arith.constant 0 : index
    %c0_1 = arith.constant 0 : index
    %c0_2 = arith.constant 0 : index
    %3 = vector.load %arg2[%c0, %c0_1, %c0_2] : memref<2x8x32xf32, #tpu.memory_space<vmem>>, vector<2x8x32xf32>
    %c0_3 = arith.constant 0 : index
    %c0_4 = arith.constant 0 : index
    %4 = vector.load %arg3[%c0_3, %c0_4] : memref<1x32xf32, #tpu.memory_space<vmem>>, vector<1x32xf32>
    %5 = vector.shape_cast %4 : vector<1x32xf32> to vector<1x1x32xf32>
    %6 = vector.broadcast %5 : vector<1x1x32xf32> to vector<2x8x32xf32>
    %7 = arith.mulf %3, %6 : vector<2x8x32xf32>
    %cst = arith.constant dense<0.000000e+00> : vector<2x8xf32>
    %8 = vector.multi_reduction <add>, %7, %cst [2] : vector<2x8x32xf32> to vector<2x8xf32>
    %9 = math.tanh %8 : vector<2x8xf32>
    %10 = math.exp %9 : vector<2x8xf32>
    %c0_5 = arith.constant 0 : index
    %c0_6 = arith.constant 0 : index
    %11 = vector.load %arg6[%c0_5, %c0_6] : memref<2x1xf32, #tpu.memory_space<vmem>>, vector<2x1xf32>
    %cst_7 = arith.constant dense<0.000000e+00> : vector<2xf32>
    %12 = vector.multi_reduction <add>, %10, %cst_7 [1] : vector<2x8xf32> to vector<2xf32>
    %13 = vector.shape_cast %12 : vector<2xf32> to vector<2x1xf32>
    %14 = arith.addf %11, %13 : vector<2x1xf32>
    %c0_8 = arith.constant 0 : index
    %c0_9 = arith.constant 0 : index
    %15 = vector.load %arg6[%c0_8, %c0_9] : memref<2x1xf32, #tpu.memory_space<vmem>>, vector<2x1xf32>
    tpu.vector_store %arg6[%c0_8, %c0_9], %14 {strides = array<i32>} : memref<2x1xf32, #tpu.memory_space<vmem>>, vector<2x1xf32>,
    %16 = vector.shape_cast %10 : vector<2x8xf32> to vector<2x1x8xf32>
    "tpu.trace_start"() <{level = 10 : i32, message = "bqk,bkd->bqd"}> : () -> ()
    %cst_10 = arith.constant dense<0.000000e+00> : vector<2x1x32xf32>
    %17 = tpu.matmul %16, %3, %cst_10 {dimension_numbers = #tpu.dot_dimension_numbers<[2], [1], [1], [2], [0, 0, 0, 1, 1, 2], [0], [0]>} : vector<2x1x8xf32>, vector<2x8x32xf32>, vector<2x1x32xf32> -> vector<2x1x32xf32>
    "tpu.trace_stop"() : () -> ()
    %c0_11 = arith.constant 0 : index
    %c0_12 = arith.constant 0 : index
    %18 = vector.load %arg5[%c0_11, %c0_12] : memref<2x32xf32, #tpu.memory_space<vmem>>, vector<2x32xf32>
    %19 = vector.shape_cast %17 : vector<2x1x32xf32> to vector<2x32xf32>
    %20 = arith.addf %18, %19 : vector<2x32xf32>
    %c0_13 = arith.constant 0 : index
    %c0_14 = arith.constant 0 : index
    %21 = vector.load %arg5[%c0_13, %c0_14] : memref<2x32xf32, #tpu.memory_space<vmem>>, vector<2x32xf32>
    tpu.vector_store %arg5[%c0_13, %c0_14], %20 {strides = array<i32>} : memref<2x32xf32, #tpu.memory_space<vmem>>, vector<2x32xf32>,
    %c0_i32_15 = arith.constant 0 : i32
    %22 = arith.cmpi eq, %arg1, %c0_i32_15 : i32
    %23 = arith.extui %22 : i1 to i32
    %c0_i32_16 = arith.constant 0 : i32
    %24 = arith.cmpi ne, %23, %c0_i32_16 : i32
    scf.if %24 {
      %c0_17 = arith.constant 0 : index
      %c0_18 = arith.constant 0 : index
      %25 = vector.load %arg5[%c0_17, %c0_18] : memref<2x32xf32, #tpu.memory_space<vmem>>, vector<2x32xf32>
      %c0_19 = arith.constant 0 : index
      %c0_20 = arith.constant 0 : index
      %26 = vector.load %arg6[%c0_19, %c0_20] : memref<2x1xf32, #tpu.memory_space<vmem>>, vector<2x1xf32>
      %27 = vector.broadcast %26 : vector<2x1xf32> to vector<2x32xf32>
      %28 = arith.divf %25, %27 : vector<2x32xf32>
      %c0_21 = arith.constant 0 : index
      %c0_22 = arith.constant 0 : index
      %29 = vector.load %arg4[%c0_21, %c0_22] : memref<2x32xf32, #tpu.memory_space<vmem>>, vector<2x32xf32>
      tpu.vector_store %arg4[%c0_21, %c0_22], %28 {strides = array<i32>} : memref<2x32xf32, #tpu.memory_space<vmem>>, vector<2x32xf32>,
    } else {
    }
    return
  }
  func.func @transform_0(%arg0: i32, %arg1: i32) -> (i32, i32, i32) {
    %c0_i32 = arith.constant 0 : i32
    %c0_i32_0 = arith.constant 0 : i32
    return %arg0, %arg1, %c0_i32 : i32, i32, i32
  }
  func.func @transform_1(%arg0: i32, %arg1: i32) -> (i32, i32) {
    %c0_i32 = arith.constant 0 : i32
    %c0_i32_0 = arith.constant 0 : i32
    %c0_i32_1 = arith.constant 0 : i32
    return %c0_i32, %c0_i32_0 : i32, i32
  }
  func.func @transform_2(%arg0: i32, %arg1: i32) -> (i32, i32) {
    %c0_i32 = arith.constant 0 : i32
    %c0_i32_0 = arith.constant 0 : i32
    return %arg0, %c0_i32 : i32, i32
  }
}

</mosaic_0001>

<bundles_post_ra>
// kernel: tpu_custom_call.1
= control target key start
LH: loop header
LB: loop body
LE: loop exit
PB: predicated region body
PF: predicated region fallthrough
CT: control target
= control target key end

     0   :  { %7 = vsyncpa [#allocation5], 0  ;;  %s403_s0 = inlined_call_operand.hbm [shape: f32[2,8,32], index: 0, kind: input, shape index: {}]   ;;  %s404_s1 = inlined_call_operand.vmem [shape: f32[1,32], index: 1, kind: input, shape index: {}]   ;;  %s405_s2 = inlined_call_operand.hbm [shape: f32[2,32], index: 2, kind: output, shape index: {}]  }
   0x1   :  { %8 = vsyncpa [#allocation6], 0  ;;  %s347_s9 = smov [#allocation4]   ;;  %s299_s13 = scalar_lea.hbm %s403_s0, 256 }
   0x2   :  { %s14_s10 = sshll.u32 %s347_s9, 4  ;;  %p300_p0 = scmp.ne.s32.totalorder %s403_s0, %s299_s13  ;;  %s15_s10 = int_to_ptr.vmem [resolvable:$true] %s14_s10 }
   0x3   :  { %p303_p1 = scmp.lt.u32.totalorder %s299_s13, %s403_s0 }
   0x5   :  { %p305_p2 = pnand %p303_p1, %p300_p0 }
   0x7   :  { %308 = shalt.err (!%p305_p2)
}
   0x8   :  { %s309_s18 = scalar_lea.vmem %s15_s10, 256  ;;  %p314_p4 = scmp.lt.s32.totalorder %s15_s10, %s15_s10 }
   0x9   :  { %p310_p3 = scmp.ne.s32.totalorder %s15_s10, %s309_s18  ;;  %p315_p5 = scmp.lt.s32.totalorder %s309_s18, %s309_s18 }
   0xb   :  { %p316_p6 = por %p315_p5, %p314_p4 }
   0xd   :  { %p317_p7 = pnand %p316_p6, %p310_p3 }
   0xf   :  { %320 = shalt.err (!%p317_p7)
}
  0x10   :  { %s348_s19 = smov 128   ;;  %s349_s20 = smov 8  }
  0x11   :  { %20 = dma.hbm_to_vmem [thread:$0]  %s403_s0, 256, %s15_s10, [#allocation5], %s348_s19, %s348_s19, %s349_s20  }
  0x12   :  { %343 = dma.done.wait [#allocation5], 256  }
  0x13   :  { %344 = vsyncadd [#allocation5], 4294967040  ;;  %v35_v0 = vld [vmem:[#allocation4 + $0x8] sm:$0xff]  ;;  %v263_v1 = vld [vmem:[%s404_s1] ss:$0 sm:$0xff]  ;;  %vm45_vm0 = vcmask 261120   ;;  %v61_v12 = vlaneseq }
  0x14   :  { %v34_v2 = vld [vmem:[#allocation4] sm:$0xff]  ;;  %v44_v3 = vmul.f32 %v263_v1, %v35_v0  ;;  %v350_v7 = vmov 0.0   ;;  %vm351_vm1 = vmmov 0   ;;  %vm32_vm2 = vcmask 1024   ;;  %s353_s0 = smov [#allocation7]  }
  0x15   :  { %v43_v4 = vmul.f32 %v263_v1, %v34_v2  ;;  %275 = vmatprep.subr.mxu1 %v350_v7  ;;  %277 = vmatprep.mubr.msk.f32.mxu1 %vm351_vm1, %v350_v7  ;;  %33 = vst.msk [vmem:[#allocation3] sm:$0x3] %vm32_vm2, %v350_v7  ;;  %v62_v15 = vand.u32 127, %v61_v12  ;;  %v64_v16 = vshrl.u32 %v61_v12, 7  ;;  %vm81_vm3 = vcmask 64512   ;;  %s254_s1 = sshll.u32 %s353_s0, 4  ;;  %s255_s1 = int_to_ptr.vmem [resolvable:$true] %s254_s1 }
  0x16   :  { %v49_v5 = vsel %vm45_vm0, %v44_v3, 0.0  ;;  %276 = vmatpush3.msra.mxu1 %v35_v0  ;;  %270 = vmatprep.subr.mxu0 %v350_v7  ;;  %vm71_vm4 = vcmask 1041409   ;;  %vm74_vm5 = vcmask 58368   ;;  %v352_v24 = vmov 0   ;;  %s321_s25 = scalar_lea.vmem %s255_s1, 32  ;;  %p326_p9 = scmp.lt.s32.totalorder %s255_s1, %s255_s1 }
  0x17   :  { %50 = vadd.xlane.f32.xlu0 %v49_v5  ;;  %v46_v6 = vsel %vm45_vm0, %v43_v4, 0.0  ;;  %271 = vmatpush3.msra.mxu0 %v34_v2  ;;  %v65_v17 = vsub.s32 %v62_v15, %v64_v16  ;;  %vm30_vm6 = vcmask 254976   ;;  %p322_p8 = scmp.ne.s32.totalorder %s255_s1, %s321_s25  ;;  %p327_p10 = scmp.lt.s32.totalorder %s321_s25, %s321_s25 }
  0x18   :  { %272 = vmatprep.mubr.msk.f32.mxu0 %vm351_vm1, %v350_v7  ;;  %287 = vset.pattern.permute.xlu1 %v352_v24  ;;  %31 = vst.msk [vmem:[#allocation2] sm:$0x3] %vm30_vm6, %v350_v7 }
  0x19   :  { %288 = vset.pattern.permute.xlu0 %v352_v24  ;;  %p328_p11 = por %p327_p10, %p326_p9 }
  0x1b   :  { %47 = vadd.xlane.f32.xlu0 %v46_v6  ;;  %p329_p12 = pnand %p328_p11, %p322_p8 }
  0x1c   :  { %v58_v25 = vld [vmem:[#allocation3] sm:$0x3] }
  0x1f   :  { %v226_v32 = vld [vmem:[#allocation2] sm:$0x3] }
  0xa4   :  { %v51_v8 = vpop.xlane.xlu0 %50 }
  0xa5   :  { %289 = vtanh.f32 %v51_v8 }
  0xa8   :  { %v48_v9 = vpop.xlane.xlu0 %47 }
  0xa9   :  { %291 = vtanh.f32 %v48_v9 }
  0xaf   :  { %v290_v10 = vpop.eup %289 }
  0xb0   :  { %v56_v11 = vmul.f32 1.442695, %v290_v10 }
  0xb2   :  { %293 = vpow2.f32 %v56_v11 }
  0xb3   :  { %v292_v13 = vpop.eup %291 }
  0xb4   :  { %v54_v14 = vmul.f32 1.442695, %v292_v13 }
  0xb6   :  { %295 = vpow2.f32 %v54_v14 }
  0xbc   :  { %v294_v18 = vpop.eup %293 }
  0xbd   :  { %v70_v19 = vrot.slane %v294_v18, %v65_v17 }
  0xbf   :  { %278 = vmatmul.mubr.msk.f32.vlgmr.msra.gmra.mrb[0].mxu1 %vm81_vm3, %v70_v19 }
  0xc0   :  { %v296_v20 = vpop.eup %295 }
  0xc1   :  { %v66_v21 = vrot.slane %v296_v20, %v65_v17 }
  0xc3   :  { %273 = vmatmul.mubr.msk.f32.vlgmr.msra.gmra.mrb[0].mxu0 %vm81_vm3, %v66_v21  ;;  %v72_v22 = vsel %vm71_vm4, %v70_v19, %v66_v21 }
  0xc4   :  { %v75_v23 = vsel %vm74_vm5, %v72_v22, 0.0 }
  0xc5   :  { %76 = vadd.xlane.f32.xlu1 %v75_v23 }
 0x152   :  { %v77_v26 = vpop.xlane.xlu1 %76 }
 0x153   :  { %v78_v27 = vadd.f32 %v77_v26, %v58_v25 }
 0x155   :  { %80 = vst.msk [vmem:[#allocation3] sm:$0x3] %vm32_vm2, %v78_v27 }
 0x15c   :  { %v239_v28 = vld [vmem:[#allocation3] sm:$0x3] }
 0x15d   :  { %242 = vperm.xlu1 %287, %v239_v28  }
 0x192   :  { %v222_v29 = vpop.f32.mrb[0].mxu1 }
 0x193   :  { %v279_v30 = vpop.f32.mrb[1].mxu1  ;;  %v229_v31 = vrot.slane %v222_v29, 7 }
 0x196   :  { %v150_v33 = vpop.f32.mrb[0].mxu0 }
 0x197   :  { %v230_v34 = vsel %vm71_vm4, %v229_v31, %v150_v33  ;;  %v274_v35 = vpop.f32.mrb[1].mxu0 }
 0x198   :  { %v232_v36 = vadd.f32 %v230_v34, %v226_v32 }
 0x19a   :  { %234 = vst.msk [vmem:[#allocation2] sm:$0x3] %vm30_vm6, %v232_v36 }
 0x1a1   :  { %v238_v39 = vld [vmem:[#allocation2] sm:$0x3] }
 0x1dc   :  { %v243_v37 = vpop.permute.xlu1 %242 }
 0x1dd   :  { %297 = vrcp.f32 %v243_v37 }
 0x1e7   :  { %v298_v38 = vpop.eup %297 }
 0x1e8   :  { %v246_v40 = vmul.f32 %v298_v38, %v238_v39 }
 0x1ea   :  { %247 = vst.msk [vmem:[#allocation7] sm:$0x3] %vm30_vm6, %v246_v40 }
 0x1eb   :  { %332 = shalt.err (!%p329_p12)
}
 0x1ec   :  { %s333_s28 = scalar_lea.hbm %s405_s2, 32 }
 0x1ed   :  { %p334_p13 = scmp.ne.s32.totalorder %s405_s2, %s333_s28  ;;  %p337_p0 = scmp.lt.u32.totalorder %s333_s28, %s405_s2 }
 0x1ef   :  { %p339_p1 = pnand %p337_p0, %p334_p13 }
 0x1f1   :  { %342 = shalt.err (!%p339_p1)
}
 0x1f2   :  { %257 = dma.vmem_to_hbm [thread:$0]  %s255_s1, 32, %s405_s2, [#allocation6]  }
 0x1f3   :  { %345 = dma.done.wait [#allocation6], 32  }
 0x1f4   :  { %346 = vsyncadd [#allocation6], 4294967264 }
 0x1f5   :  { %261 = vsyncpa [#allocation5], 1 }
 0x1f6   :  { %262 = vsyncpa [#allocation6], 1 }

</bundles_post_ra>
